<compile_context>
chip_gen: v6e
topology: v6e:2x2x1
jax: 0.10.0
libtpu: 0.0.40
codegen_flags: <defaults>
</compile_context>

<pallas_src>
import functools
import math

import jax
import jax.numpy as jnp
from jax.experimental import pallas as pl
from jax.experimental.pallas import tpu as pltpu


def _layernorm_f32(x, g, b, eps):
    mu = jnp.mean(x, axis=-1, keepdims=True)
    xc = x - mu
    var = jnp.mean(xc * xc, axis=-1, keepdims=True)
    return xc * jax.lax.rsqrt(var + eps) * g + b


# ---------------------------------------------------------------------------
# Fused BERT kernel: grid = (num_layers,), activations resident in VMEM
# scratch; pooling + classifier fused into the last grid step.
# ---------------------------------------------------------------------------
def _bert_kernel(x_emb_ref, mask_ref, emb_g_ref, emb_b_ref,
                 qkv_w_ref, qkv_b_ref, o_w_ref, o_b_ref,
                 ln1_g_ref, ln1_b_ref,
                 fc1_w_ref, fc1_b_ref, fc2_w_ref, fc2_b_ref,
                 ln2_g_ref, ln2_b_ref,
                 cls_w_ref, cls_b_ref,
                 logits_ref,
                 act_ref,
                 *, batch, seq, num_heads, eps, use_cls):
    layer = pl.program_id(0)
    n_layers = pl.num_programs(0)
    H = act_ref.shape[-1]
    dh = H // num_heads
    scale = 1.0 / math.sqrt(dh)

    # Grid step 0: embedding LayerNorm, written into the VMEM-resident
    # activation scratch (act_ref persists across the layer grid axis).
    @pl.when(layer == 0)
    def _():
        act_ref[...] = _layernorm_f32(x_emb_ref[...], emb_g_ref[...],
                                      emb_b_ref[...], eps)

    x = act_ref[...]                                  # (B*S, H) f32 residual
    mask = mask_ref[...]                              # (B, 1, S) f32 additive

    # ---- fused QKV projection: one MXU matmul, bf16 operands, f32 acc ------
    qkv = jnp.dot(x.astype(jnp.bfloat16), qkv_w_ref[...],
                  preferred_element_type=jnp.float32) + qkv_b_ref[...]  # (B*S, 3H)

    o_w = o_w_ref[...]                                # (H, H) bf16

    # ---- attention: in-kernel head split, softmax, context, output proj ----
    attn = None
    for h in range(num_heads):
        q_h = qkv[:, h * dh:(h + 1) * dh].reshape(batch, seq, dh)
        k_h = qkv[:, H + h * dh:H + (h + 1) * dh].reshape(batch, seq, dh)
        v_h = qkv[:, 2 * H + h * dh:2 * H + (h + 1) * dh].reshape(batch, seq, dh)

        # jnp.dot is not batched -> einsum for the (B, S, S) score matmuls.
        s = jnp.einsum("bqd,bkd->bqk",
                       q_h.astype(jnp.bfloat16), k_h.astype(jnp.bfloat16),
                       preferred_element_type=jnp.float32) * scale + mask
        # exp without max-subtraction: mask is exactly -1e9 (f32) and the
        # unmasked logits are bounded, so no overflow.
        p = jnp.exp(s)
        p = p * pl.reciprocal(jnp.sum(p, axis=-1, keepdims=True), approx=True)

        ctx = jnp.einsum("bqk,bkd->bqd",
                         p.astype(jnp.bfloat16), v_h.astype(jnp.bfloat16),
                         preferred_element_type=jnp.float32)
        ctx2d = ctx.reshape(batch * seq, dh)
        # Per-head slice of the output projection (avoids a lane concat).
        contrib = jnp.dot(ctx2d.astype(jnp.bfloat16), o_w[h * dh:(h + 1) * dh, :],
                          preferred_element_type=jnp.float32)
        attn = contrib if attn is None else attn + contrib
    attn = attn + o_b_ref[...]

    # ---- residual + LayerNorm 1 (fused epilogue) ----------------------------
    x = _layernorm_f32(x + attn, ln1_g_ref[...], ln1_b_ref[...], eps)

    # ---- FFN with fused residual + LayerNorm 2 ------------------------------
    h1 = jnp.dot(x.astype(jnp.bfloat16), fc1_w_ref[...],
                 preferred_element_type=jnp.float32) + fc1_b_ref[...]
    # TODO(synk): HF BERT default GELU is the exact erf form; tanh approx kept
    # here to stay within known-good Mosaic lowerings (small numeric delta).
    h1 = jax.nn.gelu(h1, approximate=True)
    h2 = jnp.dot(h1.astype(jnp.bfloat16), fc2_w_ref[...],
                 preferred_element_type=jnp.float32) + fc2_b_ref[...]
    x_out = _layernorm_f32(x + h2, ln2_g_ref[...], ln2_b_ref[...], eps)
    act_ref[...] = x_out

    # ---- last layer: fused pooling + classifier (only HBM output) -----------
    @pl.when(layer == n_layers - 1)
    def _():
        x3 = x_out.reshape(batch, seq, H)
        if use_cls:
            pooled = x3[:, 0, :]                       # CLS token, (B, H)
        else:
            # Plain (unmasked) mean over sequence — matches the reference
            # torch.mean(last_hidden_state, dim=1) exactly.
            pooled = jnp.mean(x3, axis=1)              # (B, H)
        # TODO(synk): nn.Dropout(0.2) before the classifier is the identity at
        # inference; training-mode stochastic dropout not implemented.
        logits_ref[...] = (jnp.dot(pooled.astype(jnp.bfloat16), cls_w_ref[...],
                                   preferred_element_type=jnp.float32)
                           + cls_b_ref[...]).astype(logits_ref.dtype)


def bert_forward_fused(x_emb, mask_add, params, cfg):
    L = cfg["num_layers"]
    H = cfg["hidden_size"]
    I = cfg["intermediate_size"]
    C = cfg["class_num"]
    B, _, S = mask_add.shape
    BS = x_emb.shape[0]

    c2 = lambda l: (0, 0)
    c3 = lambda l: (0, 0, 0)
    per_layer = lambda l: (l, 0, 0)

    in_specs = [
        pl.BlockSpec((BS, H), c2),                  # embeddings (read at l==0)
        pl.BlockSpec((B, 1, S), c3),                # additive attention mask
        pl.BlockSpec((1, H), c2),                   # emb LN gamma
        pl.BlockSpec((1, H), c2),                   # emb LN beta
        pl.BlockSpec((None, H, 3 * H), per_layer),  # qkv_w   (bf16)
        pl.BlockSpec((None, 1, 3 * H), per_layer),  # qkv_b
        pl.BlockSpec((None, H, H), per_layer),      # o_w     (bf16)
        pl.BlockSpec((None, 1, H), per_layer),      # o_b
        pl.BlockSpec((None, 1, H), per_layer),      # ln1_g
        pl.BlockSpec((None, 1, H), per_layer),      # ln1_b
        pl.BlockSpec((None, H, I), per_layer),      # fc1_w   (bf16)
        pl.BlockSpec((None, 1, I), per_layer),      # fc1_b
        pl.BlockSpec((None, I, H), per_layer),      # fc2_w   (bf16)
        pl.BlockSpec((None, 1, H), per_layer),      # fc2_b
        pl.BlockSpec((None, 1, H), per_layer),      # ln2_g
        pl.BlockSpec((None, 1, H), per_layer),      # ln2_b
        pl.BlockSpec((H, C), c2),                   # classifier weight (bf16)
        pl.BlockSpec((1, C), c2),                   # classifier bias
    ]

    kernel = functools.partial(_bert_kernel, batch=B, seq=S,
                               num_heads=cfg["num_heads"], eps=1e-12,
                               use_cls=bool(cfg["use_cls"]))

    return pl.pallas_call(
        kernel,
        out_shape=jax.ShapeDtypeStruct((B, C), jnp.float32),
        grid=(L,),
        in_specs=in_specs,
        out_specs=pl.BlockSpec((B, C), c2),         # written only at last layer
        scratch_shapes=[pltpu.VMEM((BS, H), jnp.float32)],  # resident activations
        compiler_params=pltpu.CompilerParams(
            dimension_semantics=("arbitrary",)),    # layers are sequential
    )(x_emb, mask_add,
      params["emb_ln_g"], params["emb_ln_b"],
      params["qkv_w"], params["qkv_b"], params["o_w"], params["o_b"],
      params["ln1_g"], params["ln1_b"],
      params["fc1_w"], params["fc1_b"], params["fc2_w"], params["fc2_b"],
      params["ln2_g"], params["ln2_b"],
      params["cls_w"], params["cls_b"])


# ---------------------------------------------------------------------------
# Model glue (plain JAX: embedding gather, mask construction)
# ---------------------------------------------------------------------------
def bert_classifier_forward(params, input_ids, attention_mask, cfg):
    B, S = input_ids.shape
    H = cfg["hidden_size"]

    # Embedding gather/sum stays in XLA (table lookup); the embedding LayerNorm
    # is fused into the encoder kernel's first grid step.
    emb = (jnp.take(params["word_emb"], input_ids, axis=0)
           + params["pos_emb"][:S][None, :, :]
           + params["type_emb"][0][None, None, :])           # (B, S, H) f32

    # HF-style additive attention mask, kept in f32 so -1e9 is applied exactly
    # even though matmul operands are bf16.
    mask_add = ((1.0 - attention_mask.astype(jnp.float32)) * -1e9)[:, None, :]

    return bert_forward_fused(emb.reshape(B * S, H), mask_add, params, cfg)


def init_params(key, cfg):
    H, I, L = cfg["hidden_size"], cfg["intermediate_size"], cfg["num_layers"]
    C = cfg["class_num"]

    def dense_bf16(k, shape):  # MXU operand weights stored in bf16
        return (jax.random.normal(k, shape, jnp.float32) * 0.02).astype(jnp.bfloat16)

    keys = iter(jax.random.split(key, 16))
    return {
        "word_emb": jax.random.normal(next(keys), (cfg["vocab_size"], H), jnp.float32) * 0.02,
        "pos_emb":  jax.random.normal(next(keys), (cfg["max_position"], H), jnp.float32) * 0.02,
        "type_emb": jax.random.normal(next(keys), (2, H), jnp.float32) * 0.02,
        "emb_ln_g": jnp.ones((1, H), jnp.float32),
        "emb_ln_b": jnp.zeros((1, H), jnp.float32),
        # Per-layer weights stacked on a leading layer axis (streamed by the
        # fused kernel's grid); Q/K/V weights concatenated to [H, 3H].
        "qkv_w": dense_bf16(next(keys), (L, H, 3 * H)),
        "qkv_b": jnp.zeros((L, 1, 3 * H), jnp.float32),
        "o_w":   dense_bf16(next(keys), (L, H, H)),
        "o_b":   jnp.zeros((L, 1, H), jnp.float32),
        "ln1_g": jnp.ones((L, 1, H), jnp.float32),
        "ln1_b": jnp.zeros((L, 1, H), jnp.float32),
        "fc1_w": dense_bf16(next(keys), (L, H, I)),
        "fc1_b": jnp.zeros((L, 1, I), jnp.float32),
        "fc2_w": dense_bf16(next(keys), (L, I, H)),
        "fc2_b": jnp.zeros((L, 1, H), jnp.float32),
        "ln2_g": jnp.ones((L, 1, H), jnp.float32),
        "ln2_b": jnp.zeros((L, 1, H), jnp.float32),
        "cls_w": dense_bf16(next(keys), (H, C)),
        "cls_b": jnp.zeros((1, C), jnp.float32),
    }


if __name__ == "__main__":
    cfg = dict(
        vocab_size=128,
        max_position=16,
        hidden_size=32,
        intermediate_size=64,
        num_heads=2,
        num_layers=2,
        class_num=3,
        use_cls=True,
    )

    key = jax.random.PRNGKey(0)
    k_params, k_ids = jax.random.split(key)
    params = init_params(k_params, cfg)

    B, S = 2, 8
    input_ids = jax.random.randint(k_ids, (B, S), 0, cfg["vocab_size"], dtype=jnp.int32)
    attention_mask = jnp.ones((B, S), dtype=jnp.int32)

    # CLS-pooling path.
    fwd_cls = jax.jit(functools.partial(bert_classifier_forward, cfg=cfg))
    logits_cls = fwd_cls(params, input_ids, attention_mask)
    jax.block_until_ready(logits_cls)
    assert logits_cls.shape == (B, cfg["class_num"])

    # Mean-pooling path (use_cls=False) — validates the fused mean+classifier.
    cfg_mean = dict(cfg, use_cls=False)
    fwd_mean = jax.jit(functools.partial(bert_classifier_forward, cfg=cfg_mean))
    logits_mean = fwd_mean(params, input_ids, attention_mask)
    jax.block_until_ready(logits_mean)
    assert logits_mean.shape == (B, cfg["class_num"])

    print("KERNEL_OK")
</pallas_src>

<mosaic_0001>
module attributes {stable_mosaic.version = 11 : i64} {
  func.func @_bert_kernel(%arg0: i32, %arg1: memref<16x32xf32, #tpu.memory_space<vmem>>, %arg2: memref<2x1x8xf32, #tpu.memory_space<vmem>>, %arg3: memref<1x32xf32, #tpu.memory_space<vmem>>, %arg4: memref<1x32xf32, #tpu.memory_space<vmem>>, %arg5: memref<1x32x96xbf16, #tpu.memory_space<vmem>>, %arg6: memref<1x1x96xf32, #tpu.memory_space<vmem>>, %arg7: memref<1x32x32xbf16, #tpu.memory_space<vmem>>, %arg8: memref<1x1x32xf32, #tpu.memory_space<vmem>>, %arg9: memref<1x1x32xf32, #tpu.memory_space<vmem>>, %arg10: memref<1x1x32xf32, #tpu.memory_space<vmem>>, %arg11: memref<1x32x64xbf16, #tpu.memory_space<vmem>>, %arg12: memref<1x1x64xf32, #tpu.memory_space<vmem>>, %arg13: memref<1x64x32xbf16, #tpu.memory_space<vmem>>, %arg14: memref<1x1x32xf32, #tpu.memory_space<vmem>>, %arg15: memref<1x1x32xf32, #tpu.memory_space<vmem>>, %arg16: memref<1x1x32xf32, #tpu.memory_space<vmem>>, %arg17: memref<32x3xbf16, #tpu.memory_space<vmem>>, %arg18: memref<1x3xf32, #tpu.memory_space<vmem>>, %arg19: memref<2x3xf32, #tpu.memory_space<vmem>>, %arg20: memref<16x32xf32, #tpu.memory_space<vmem>>) attributes {dimension_semantics = [#tpu.dimension_semantics<arbitrary>], iteration_bounds = array<i64: 2>, scalar_prefetch = 0 : i64, scratch_operands = 1 : i64, tpu.core_type = #tpu.core_type<tc>, window_params = [{pipeline_mode = #tpu.pipeline_mode<synchronous>, transform_indices = @transform_0, window_bounds = array<i64: 16, 32>}, {pipeline_mode = #tpu.pipeline_mode<synchronous>, transform_indices = @transform_1, window_bounds = array<i64: 2, 1, 8>}, {pipeline_mode = #tpu.pipeline_mode<synchronous>, transform_indices = @transform_2, window_bounds = array<i64: 1, 32>}, {pipeline_mode = #tpu.pipeline_mode<synchronous>, transform_indices = @transform_3, window_bounds = array<i64: 1, 32>}, {transform_indices = @transform_4, window_bounds = array<i64: 1, 32, 96>}, {transform_indices = @transform_5, window_bounds = array<i64: 1, 1, 96>}, {transform_indices = @transform_6, window_bounds = array<i64: 1, 32, 32>}, {transform_indices = @transform_7, window_bounds = array<i64: 1, 1, 32>}, {transform_indices = @transform_8, window_bounds = array<i64: 1, 1, 32>}, {transform_indices = @transform_9, window_bounds = array<i64: 1, 1, 32>}, {transform_indices = @transform_10, window_bounds = array<i64: 1, 32, 64>}, {transform_indices = @transform_11, window_bounds = array<i64: 1, 1, 64>}, {transform_indices = @transform_12, window_bounds = array<i64: 1, 64, 32>}, {transform_indices = @transform_13, window_bounds = array<i64: 1, 1, 32>}, {transform_indices = @transform_14, window_bounds = array<i64: 1, 1, 32>}, {transform_indices = @transform_15, window_bounds = array<i64: 1, 1, 32>}, {pipeline_mode = #tpu.pipeline_mode<synchronous>, transform_indices = @transform_16, window_bounds = array<i64: 32, 3>}, {pipeline_mode = #tpu.pipeline_mode<synchronous>, transform_indices = @transform_17, window_bounds = array<i64: 1, 3>}, {pipeline_mode = #tpu.pipeline_mode<synchronous>, transform_indices = @transform_18, window_bounds = array<i64: 2, 3>}]} {
    %c0_i32 = arith.constant 0 : i32
    %0 = arith.cmpi eq, %arg0, %c0_i32 : i32
    %1 = arith.extui %0 : i1 to i32
    %c0_i32_0 = arith.constant 0 : i32
    %2 = arith.cmpi ne, %1, %c0_i32_0 : i32
    scf.if %2 {
      %c0_70 = arith.constant 0 : index
      %c0_71 = arith.constant 0 : index
      %155 = vector.load %arg1[%c0_70, %c0_71] : memref<16x32xf32, #tpu.memory_space<vmem>>, vector<16x32xf32>
      %c0_72 = arith.constant 0 : index
      %c0_73 = arith.constant 0 : index
      %156 = vector.load %arg3[%c0_72, %c0_73] : memref<1x32xf32, #tpu.memory_space<vmem>>, vector<1x32xf32>
      %c0_74 = arith.constant 0 : index
      %c0_75 = arith.constant 0 : index
      %157 = vector.load %arg4[%c0_74, %c0_75] : memref<1x32xf32, #tpu.memory_space<vmem>>, vector<1x32xf32>
      %cst_76 = arith.constant dense<0.000000e+00> : vector<16xf32>
      %158 = vector.multi_reduction <add>, %155, %cst_76 [1] : vector<16x32xf32> to vector<16xf32>
      %159 = vector.shape_cast %158 : vector<16xf32> to vector<16x1xf32>
      %cst_77 = arith.constant 3.200000e+01 : f32
      %160 = vector.broadcast %cst_77 : f32 to vector<16x1xf32>
      %161 = arith.divf %159, %160 : vector<16x1xf32>
      %162 = vector.broadcast %161 : vector<16x1xf32> to vector<16x32xf32>
      %163 = arith.subf %155, %162 : vector<16x32xf32>
      %164 = arith.mulf %163, %163 : vector<16x32xf32>
      %cst_78 = arith.constant dense<0.000000e+00> : vector<16xf32>
      %165 = vector.multi_reduction <add>, %164, %cst_78 [1] : vector<16x32xf32> to vector<16xf32>
      %166 = vector.shape_cast %165 : vector<16xf32> to vector<16x1xf32>
      %cst_79 = arith.constant 3.200000e+01 : f32
      %167 = vector.broadcast %cst_79 : f32 to vector<16x1xf32>
      %168 = arith.divf %166, %167 : vector<16x1xf32>
      %cst_80 = arith.constant 9.99999996E-13 : f32
      %169 = vector.broadcast %cst_80 : f32 to vector<16x1xf32>
      %170 = arith.addf %168, %169 : vector<16x1xf32>
      %171 = math.rsqrt %170 : vector<16x1xf32>
      %172 = vector.broadcast %171 : vector<16x1xf32> to vector<16x32xf32>
      %173 = arith.mulf %163, %172 : vector<16x32xf32>
      %174 = vector.broadcast %156 : vector<1x32xf32> to vector<16x32xf32>
      %175 = arith.mulf %173, %174 : vector<16x32xf32>
      %176 = vector.broadcast %157 : vector<1x32xf32> to vector<16x32xf32>
      %177 = arith.addf %175, %176 : vector<16x32xf32>
      %c0_81 = arith.constant 0 : index
      %c0_82 = arith.constant 0 : index
      %178 = vector.load %arg20[%c0_81, %c0_82] : memref<16x32xf32, #tpu.memory_space<vmem>>, vector<16x32xf32>
      tpu.vector_store %arg20[%c0_81, %c0_82], %177 {strides = array<i32>} : memref<16x32xf32, #tpu.memory_space<vmem>>, vector<16x32xf32>,
    } else {
    }
    %c0 = arith.constant 0 : index
    %c0_1 = arith.constant 0 : index
    %3 = vector.load %arg20[%c0, %c0_1] : memref<16x32xf32, #tpu.memory_space<vmem>>, vector<16x32xf32>
    %c0_2 = arith.constant 0 : index
    %c0_3 = arith.constant 0 : index
    %c0_4 = arith.constant 0 : index
    %4 = vector.load %arg2[%c0_2, %c0_3, %c0_4] : memref<2x1x8xf32, #tpu.memory_space<vmem>>, vector<2x1x8xf32>
    %5 = arith.truncf %3 : vector<16x32xf32> to vector<16x32xbf16>
    %c0_5 = arith.constant 0 : index
    %c0_6 = arith.constant 0 : index
    %c0_7 = arith.constant 0 : index
    %6 = vector.load %arg5[%c0_5, %c0_6, %c0_7] : memref<1x32x96xbf16, #tpu.memory_space<vmem>>, vector<1x32x96xbf16>
    %7 = vector.shape_cast %6 : vector<1x32x96xbf16> to vector<32x96xbf16>
    %cst = arith.constant dense<0.000000e+00> : vector<16x96xf32>
    %8 = tpu.matmul %5, %7, %cst {dimension_numbers = #tpu.dot_dimension_numbers<[1], [0], [0], [1], [0, 0, 1, 1], [], []>} : vector<16x32xbf16>, vector<32x96xbf16>, vector<16x96xf32> -> vector<16x96xf32>
    %c0_8 = arith.constant 0 : index
    %c0_9 = arith.constant 0 : index
    %c0_10 = arith.constant 0 : index
    %9 = vector.load %arg6[%c0_8, %c0_9, %c0_10] : memref<1x1x96xf32, #tpu.memory_space<vmem>>, vector<1x1x96xf32>
    %10 = vector.shape_cast %9 : vector<1x1x96xf32> to vector<1x96xf32>
    %11 = vector.broadcast %10 : vector<1x96xf32> to vector<16x96xf32>
    %12 = arith.addf %8, %11 : vector<16x96xf32>
    %c0_11 = arith.constant 0 : index
    %c0_12 = arith.constant 0 : index
    %c0_13 = arith.constant 0 : index
    %13 = vector.load %arg7[%c0_11, %c0_12, %c0_13] : memref<1x32x32xbf16, #tpu.memory_space<vmem>>, vector<1x32x32xbf16>
    %14 = vector.shape_cast %13 : vector<1x32x32xbf16> to vector<32x32xbf16>
    %15 = vector.extract_strided_slice %12 {offsets = [0, 0], sizes = [16, 16], strides = [1, 1]} : vector<16x96xf32> to vector<16x16xf32>
    %16 = vector.shape_cast %15 : vector<16x16xf32> to vector<2x8x16xf32>
    %17 = vector.extract_strided_slice %12 {offsets = [0, 32], sizes = [16, 16], strides = [1, 1]} : vector<16x96xf32> to vector<16x16xf32>
    %18 = vector.shape_cast %17 : vector<16x16xf32> to vector<2x8x16xf32>
    %19 = vector.extract_strided_slice %12 {offsets = [0, 64], sizes = [16, 16], strides = [1, 1]} : vector<16x96xf32> to vector<16x16xf32>
    %20 = vector.shape_cast %19 : vector<16x16xf32> to vector<2x8x16xf32>
    %21 = arith.truncf %16 : vector<2x8x16xf32> to vector<2x8x16xbf16>
    %22 = arith.truncf %18 : vector<2x8x16xf32> to vector<2x8x16xbf16>
    "tpu.trace_start"() <{level = 10 : i32, message = "bqd,bkd->bqk"}> : () -> ()
    %cst_14 = arith.constant dense<0.000000e+00> : vector<2x8x8xf32>
    %23 = tpu.matmul %21, %22, %cst_14 {dimension_numbers = #tpu.dot_dimension_numbers<[2], [2], [1], [1], [0, 0, 0, 1, 1, 1], [0], [0]>} : vector<2x8x16xbf16>, vector<2x8x16xbf16>, vector<2x8x8xf32> -> vector<2x8x8xf32>
    "tpu.trace_stop"() : () -> ()
    %cst_15 = arith.constant 2.500000e-01 : f32
    %24 = vector.broadcast %cst_15 : f32 to vector<2x8x8xf32>
    %25 = arith.mulf %23, %24 : vector<2x8x8xf32>
    %26 = vector.broadcast %4 : vector<2x1x8xf32> to vector<2x8x8xf32>
    %27 = arith.addf %25, %26 : vector<2x8x8xf32>
    %28 = math.exp %27 : vector<2x8x8xf32>
    %cst_16 = arith.constant dense<0.000000e+00> : vector<2x8xf32>
    %29 = vector.multi_reduction <add>, %28, %cst_16 [2] : vector<2x8x8xf32> to vector<2x8xf32>
    %30 = vector.shape_cast %29 : vector<2x8xf32> to vector<2x8x1xf32>
    %31 = tpu.reciprocal %30 {approx = true} : vector<2x8x1xf32> -> vector<2x8x1xf32>
    %32 = vector.broadcast %31 : vector<2x8x1xf32> to vector<2x8x8xf32>
    %33 = arith.mulf %28, %32 : vector<2x8x8xf32>
    %34 = arith.truncf %33 : vector<2x8x8xf32> to vector<2x8x8xbf16>
    %35 = arith.truncf %20 : vector<2x8x16xf32> to vector<2x8x16xbf16>
    "tpu.trace_start"() <{level = 10 : i32, message = "bqk,bkd->bqd"}> : () -> ()
    %cst_17 = arith.constant dense<0.000000e+00> : vector<2x8x16xf32>
    %36 = tpu.matmul %34, %35, %cst_17 {dimension_numbers = #tpu.dot_dimension_numbers<[2], [1], [1], [2], [0, 0, 0, 1, 1, 2], [0], [0]>} : vector<2x8x8xbf16>, vector<2x8x16xbf16>, vector<2x8x16xf32> -> vector<2x8x16xf32>
    "tpu.trace_stop"() : () -> ()
    %37 = vector.shape_cast %36 : vector<2x8x16xf32> to vector<16x16xf32>
    %38 = arith.truncf %37 : vector<16x16xf32> to vector<16x16xbf16>
    %39 = vector.extract_strided_slice %14 {offsets = [0, 0], sizes = [16, 32], strides = [1, 1]} : vector<32x32xbf16> to vector<16x32xbf16>
    %cst_18 = arith.constant dense<0.000000e+00> : vector<16x32xf32>
    %40 = tpu.matmul %38, %39, %cst_18 {dimension_numbers = #tpu.dot_dimension_numbers<[1], [0], [0], [1], [0, 0, 1, 1], [], []>} : vector<16x16xbf16>, vector<16x32xbf16>, vector<16x32xf32> -> vector<16x32xf32>
    %41 = vector.extract_strided_slice %12 {offsets = [0, 16], sizes = [16, 16], strides = [1, 1]} : vector<16x96xf32> to vector<16x16xf32>
    %42 = vector.shape_cast %41 : vector<16x16xf32> to vector<2x8x16xf32>
    %43 = vector.extract_strided_slice %12 {offsets = [0, 48], sizes = [16, 16], strides = [1, 1]} : vector<16x96xf32> to vector<16x16xf32>
    %44 = vector.shape_cast %43 : vector<16x16xf32> to vector<2x8x16xf32>
    %45 = vector.extract_strided_slice %12 {offsets = [0, 80], sizes = [16, 16], strides = [1, 1]} : vector<16x96xf32> to vector<16x16xf32>
    %46 = vector.shape_cast %45 : vector<16x16xf32> to vector<2x8x16xf32>
    %47 = arith.truncf %42 : vector<2x8x16xf32> to vector<2x8x16xbf16>
    %48 = arith.truncf %44 : vector<2x8x16xf32> to vector<2x8x16xbf16>
    "tpu.trace_start"() <{level = 10 : i32, message = "bqd,bkd->bqk"}> : () -> ()
    %cst_19 = arith.constant dense<0.000000e+00> : vector<2x8x8xf32>
    %49 = tpu.matmul %47, %48, %cst_19 {dimension_numbers = #tpu.dot_dimension_numbers<[2], [2], [1], [1], [0, 0, 0, 1, 1, 1], [0], [0]>} : vector<2x8x16xbf16>, vector<2x8x16xbf16>, vector<2x8x8xf32> -> vector<2x8x8xf32>
    "tpu.trace_stop"() : () -> ()
    %cst_20 = arith.constant 2.500000e-01 : f32
    %50 = vector.broadcast %cst_20 : f32 to vector<2x8x8xf32>
    %51 = arith.mulf %49, %50 : vector<2x8x8xf32>
    %52 = vector.broadcast %4 : vector<2x1x8xf32> to vector<2x8x8xf32>
    %53 = arith.addf %51, %52 : vector<2x8x8xf32>
    %54 = math.exp %53 : vector<2x8x8xf32>
    %cst_21 = arith.constant dense<0.000000e+00> : vector<2x8xf32>
    %55 = vector.multi_reduction <add>, %54, %cst_21 [2] : vector<2x8x8xf32> to vector<2x8xf32>
    %56 = vector.shape_cast %55 : vector<2x8xf32> to vector<2x8x1xf32>
    %57 = tpu.reciprocal %56 {approx = true} : vector<2x8x1xf32> -> vector<2x8x1xf32>
    %58 = vector.broadcast %57 : vector<2x8x1xf32> to vector<2x8x8xf32>
    %59 = arith.mulf %54, %58 : vector<2x8x8xf32>
    %60 = arith.truncf %59 : vector<2x8x8xf32> to vector<2x8x8xbf16>
    %61 = arith.truncf %46 : vector<2x8x16xf32> to vector<2x8x16xbf16>
    "tpu.trace_start"() <{level = 10 : i32, message = "bqk,bkd->bqd"}> : () -> ()
    %cst_22 = arith.constant dense<0.000000e+00> : vector<2x8x16xf32>
    %62 = tpu.matmul %60, %61, %cst_22 {dimension_numbers = #tpu.dot_dimension_numbers<[2], [1], [1], [2], [0, 0, 0, 1, 1, 2], [0], [0]>} : vector<2x8x8xbf16>, vector<2x8x16xbf16>, vector<2x8x16xf32> -> vector<2x8x16xf32>
    "tpu.trace_stop"() : () -> ()
    %63 = vector.shape_cast %62 : vector<2x8x16xf32> to vector<16x16xf32>
    %64 = arith.truncf %63 : vector<16x16xf32> to vector<16x16xbf16>
    %65 = vector.extract_strided_slice %14 {offsets = [16, 0], sizes = [16, 32], strides = [1, 1]} : vector<32x32xbf16> to vector<16x32xbf16>
    %cst_23 = arith.constant dense<0.000000e+00> : vector<16x32xf32>
    %66 = tpu.matmul %64, %65, %cst_23 {dimension_numbers = #tpu.dot_dimension_numbers<[1], [0], [0], [1], [0, 0, 1, 1], [], []>} : vector<16x16xbf16>, vector<16x32xbf16>, vector<16x32xf32> -> vector<16x32xf32>
    %67 = arith.addf %40, %66 : vector<16x32xf32>
    %c0_24 = arith.constant 0 : index
    %c0_25 = arith.constant 0 : index
    %c0_26 = arith.constant 0 : index
    %68 = vector.load %arg8[%c0_24, %c0_25, %c0_26] : memref<1x1x32xf32, #tpu.memory_space<vmem>>, vector<1x1x32xf32>
    %69 = vector.shape_cast %68 : vector<1x1x32xf32> to vector<1x32xf32>
    %70 = vector.broadcast %69 : vector<1x32xf32> to vector<16x32xf32>
    %71 = arith.addf %67, %70 : vector<16x32xf32>
    %72 = arith.addf %3, %71 : vector<16x32xf32>
    %c0_27 = arith.constant 0 : index
    %c0_28 = arith.constant 0 : index
    %c0_29 = arith.constant 0 : index
    %73 = vector.load %arg9[%c0_27, %c0_28, %c0_29] : memref<1x1x32xf32, #tpu.memory_space<vmem>>, vector<1x1x32xf32>
    %74 = vector.shape_cast %73 : vector<1x1x32xf32> to vector<1x32xf32>
    %c0_30 = arith.constant 0 : index
    %c0_31 = arith.constant 0 : index
    %c0_32 = arith.constant 0 : index
    %75 = vector.load %arg10[%c0_30, %c0_31, %c0_32] : memref<1x1x32xf32, #tpu.memory_space<vmem>>, vector<1x1x32xf32>
    %76 = vector.shape_cast %75 : vector<1x1x32xf32> to vector<1x32xf32>
    %cst_33 = arith.constant dense<0.000000e+00> : vector<16xf32>
    %77 = vector.multi_reduction <add>, %72, %cst_33 [1] : vector<16x32xf32> to vector<16xf32>
    %78 = vector.shape_cast %77 : vector<16xf32> to vector<16x1xf32>
    %cst_34 = arith.constant 3.200000e+01 : f32
    %79 = vector.broadcast %cst_34 : f32 to vector<16x1xf32>
    %80 = arith.divf %78, %79 : vector<16x1xf32>
    %81 = vector.broadcast %80 : vector<16x1xf32> to vector<16x32xf32>
    %82 = arith.subf %72, %81 : vector<16x32xf32>
    %83 = arith.mulf %82, %82 : vector<16x32xf32>
    %cst_35 = arith.constant dense<0.000000e+00> : vector<16xf32>
    %84 = vector.multi_reduction <add>, %83, %cst_35 [1] : vector<16x32xf32> to vector<16xf32>
    %85 = vector.shape_cast %84 : vector<16xf32> to vector<16x1xf32>
    %cst_36 = arith.constant 3.200000e+01 : f32
    %86 = vector.broadcast %cst_36 : f32 to vector<16x1xf32>
    %87 = arith.divf %85, %86 : vector<16x1xf32>
    %cst_37 = arith.constant 9.99999996E-13 : f32
    %88 = vector.broadcast %cst_37 : f32 to vector<16x1xf32>
    %89 = arith.addf %87, %88 : vector<16x1xf32>
    %90 = math.rsqrt %89 : vector<16x1xf32>
    %91 = vector.broadcast %90 : vector<16x1xf32> to vector<16x32xf32>
    %92 = arith.mulf %82, %91 : vector<16x32xf32>
    %93 = vector.broadcast %74 : vector<1x32xf32> to vector<16x32xf32>
    %94 = arith.mulf %92, %93 : vector<16x32xf32>
    %95 = vector.broadcast %76 : vector<1x32xf32> to vector<16x32xf32>
    %96 = arith.addf %94, %95 : vector<16x32xf32>
    %97 = arith.truncf %96 : vector<16x32xf32> to vector<16x32xbf16>
    %c0_38 = arith.constant 0 : index
    %c0_39 = arith.constant 0 : index
    %c0_40 = arith.constant 0 : index
    %98 = vector.load %arg11[%c0_38, %c0_39, %c0_40] : memref<1x32x64xbf16, #tpu.memory_space<vmem>>, vector<1x32x64xbf16>
    %99 = vector.shape_cast %98 : vector<1x32x64xbf16> to vector<32x64xbf16>
    %cst_41 = arith.constant dense<0.000000e+00> : vector<16x64xf32>
    %100 = tpu.matmul %97, %99, %cst_41 {dimension_numbers = #tpu.dot_dimension_numbers<[1], [0], [0], [1], [0, 0, 1, 1], [], []>} : vector<16x32xbf16>, vector<32x64xbf16>, vector<16x64xf32> -> vector<16x64xf32>
    %c0_42 = arith.constant 0 : index
    %c0_43 = arith.constant 0 : index
    %c0_44 = arith.constant 0 : index
    %101 = vector.load %arg12[%c0_42, %c0_43, %c0_44] : memref<1x1x64xf32, #tpu.memory_space<vmem>>, vector<1x1x64xf32>
    %102 = vector.shape_cast %101 : vector<1x1x64xf32> to vector<1x64xf32>
    %103 = vector.broadcast %102 : vector<1x64xf32> to vector<16x64xf32>
    %104 = arith.addf %100, %103 : vector<16x64xf32>
    %105 = arith.mulf %104, %104 : vector<16x64xf32>
    %106 = arith.mulf %104, %105 : vector<16x64xf32>
    %cst_45 = arith.constant 4.471500e-02 : f32
    %107 = vector.broadcast %cst_45 : f32 to vector<16x64xf32>
    %108 = arith.mulf %107, %106 : vector<16x64xf32>
    %109 = arith.addf %104, %108 : vector<16x64xf32>
    %cst_46 = arith.constant 0.797884583 : f32
    %110 = vector.broadcast %cst_46 : f32 to vector<16x64xf32>
    %111 = arith.mulf %110, %109 : vector<16x64xf32>
    %112 = math.tanh %111 : vector<16x64xf32>
    %cst_47 = arith.constant 1.000000e+00 : f32
    %113 = vector.broadcast %cst_47 : f32 to vector<16x64xf32>
    %114 = arith.addf %113, %112 : vector<16x64xf32>
    %cst_48 = arith.constant 5.000000e-01 : f32
    %115 = vector.broadcast %cst_48 : f32 to vector<16x64xf32>
    %116 = arith.mulf %115, %114 : vector<16x64xf32>
    %117 = arith.mulf %104, %116 : vector<16x64xf32>
    %118 = arith.truncf %117 : vector<16x64xf32> to vector<16x64xbf16>
    %c0_49 = arith.constant 0 : index
    %c0_50 = arith.constant 0 : index
    %c0_51 = arith.constant 0 : index
    %119 = vector.load %arg13[%c0_49, %c0_50, %c0_51] : memref<1x64x32xbf16, #tpu.memory_space<vmem>>, vector<1x64x32xbf16>
    %120 = vector.shape_cast %119 : vector<1x64x32xbf16> to vector<64x32xbf16>
    %cst_52 = arith.constant dense<0.000000e+00> : vector<16x32xf32>
    %121 = tpu.matmul %118, %120, %cst_52 {dimension_numbers = #tpu.dot_dimension_numbers<[1], [0], [0], [1], [0, 0, 1, 1], [], []>} : vector<16x64xbf16>, vector<64x32xbf16>, vector<16x32xf32> -> vector<16x32xf32>
    %c0_53 = arith.constant 0 : index
    %c0_54 = arith.constant 0 : index
    %c0_55 = arith.constant 0 : index
    %122 = vector.load %arg14[%c0_53, %c0_54, %c0_55] : memref<1x1x32xf32, #tpu.memory_space<vmem>>, vector<1x1x32xf32>
    %123 = vector.shape_cast %122 : vector<1x1x32xf32> to vector<1x32xf32>
    %124 = vector.broadcast %123 : vector<1x32xf32> to vector<16x32xf32>
    %125 = arith.addf %121, %124 : vector<16x32xf32>
    %126 = arith.addf %96, %125 : vector<16x32xf32>
    %c0_56 = arith.constant 0 : index
    %c0_57 = arith.constant 0 : index
    %c0_58 = arith.constant 0 : index
    %127 = vector.load %arg15[%c0_56, %c0_57, %c0_58] : memref<1x1x32xf32, #tpu.memory_space<vmem>>, vector<1x1x32xf32>
    %128 = vector.shape_cast %127 : vector<1x1x32xf32> to vector<1x32xf32>
    %c0_59 = arith.constant 0 : index
    %c0_60 = arith.constant 0 : index
    %c0_61 = arith.constant 0 : index
    %129 = vector.load %arg16[%c0_59, %c0_60, %c0_61] : memref<1x1x32xf32, #tpu.memory_space<vmem>>, vector<1x1x32xf32>
    %130 = vector.shape_cast %129 : vector<1x1x32xf32> to vector<1x32xf32>
    %cst_62 = arith.constant dense<0.000000e+00> : vector<16xf32>
    %131 = vector.multi_reduction <add>, %126, %cst_62 [1] : vector<16x32xf32> to vector<16xf32>
    %132 = vector.shape_cast %131 : vector<16xf32> to vector<16x1xf32>
    %cst_63 = arith.constant 3.200000e+01 : f32
    %133 = vector.broadcast %cst_63 : f32 to vector<16x1xf32>
    %134 = arith.divf %132, %133 : vector<16x1xf32>
    %135 = vector.broadcast %134 : vector<16x1xf32> to vector<16x32xf32>
    %136 = arith.subf %126, %135 : vector<16x32xf32>
    %137 = arith.mulf %136, %136 : vector<16x32xf32>
    %cst_64 = arith.constant dense<0.000000e+00> : vector<16xf32>
    %138 = vector.multi_reduction <add>, %137, %cst_64 [1] : vector<16x32xf32> to vector<16xf32>
    %139 = vector.shape_cast %138 : vector<16xf32> to vector<16x1xf32>
    %cst_65 = arith.constant 3.200000e+01 : f32
    %140 = vector.broadcast %cst_65 : f32 to vector<16x1xf32>
    %141 = arith.divf %139, %140 : vector<16x1xf32>
    %cst_66 = arith.constant 9.99999996E-13 : f32
    %142 = vector.broadcast %cst_66 : f32 to vector<16x1xf32>
    %143 = arith.addf %141, %142 : vector<16x1xf32>
    %144 = math.rsqrt %143 : vector<16x1xf32>
    %145 = vector.broadcast %144 : vector<16x1xf32> to vector<16x32xf32>
    %146 = arith.mulf %136, %145 : vector<16x32xf32>
    %147 = vector.broadcast %128 : vector<1x32xf32> to vector<16x32xf32>
    %148 = arith.mulf %146, %147 : vector<16x32xf32>
    %149 = vector.broadcast %130 : vector<1x32xf32> to vector<16x32xf32>
    %150 = arith.addf %148, %149 : vector<16x32xf32>
    %c0_67 = arith.constant 0 : index
    %c0_68 = arith.constant 0 : index
    %151 = vector.load %arg20[%c0_67, %c0_68] : memref<16x32xf32, #tpu.memory_space<vmem>>, vector<16x32xf32>
    tpu.vector_store %arg20[%c0_67, %c0_68], %150 {strides = array<i32>} : memref<16x32xf32, #tpu.memory_space<vmem>>, vector<16x32xf32>,
    %c1_i32 = arith.constant 1 : i32
    %152 = arith.cmpi eq, %arg0, %c1_i32 : i32
    %153 = arith.extui %152 : i1 to i32
    %c0_i32_69 = arith.constant 0 : i32
    %154 = arith.cmpi ne, %153, %c0_i32_69 : i32
    scf.if %154 {
      %155 = vector.shape_cast %150 : vector<16x32xf32> to vector<2x8x32xf32>
      %156 = vector.extract_strided_slice %155 {offsets = [0, 0, 0], sizes = [2, 1, 32], strides = [1, 1, 1]} : vector<2x8x32xf32> to vector<2x1x32xf32>
      %157 = vector.shape_cast %156 : vector<2x1x32xf32> to vector<2x32xf32>
      %158 = arith.truncf %157 : vector<2x32xf32> to vector<2x32xbf16>
      %c0_70 = arith.constant 0 : index
      %c0_71 = arith.constant 0 : index
      %159 = vector.load %arg17[%c0_70, %c0_71] : memref<32x3xbf16, #tpu.memory_space<vmem>>, vector<32x3xbf16>
      %cst_72 = arith.constant dense<0.000000e+00> : vector<2x3xf32>
      %160 = tpu.matmul %158, %159, %cst_72 {dimension_numbers = #tpu.dot_dimension_numbers<[1], [0], [0], [1], [0, 0, 1, 1], [], []>} : vector<2x32xbf16>, vector<32x3xbf16>, vector<2x3xf32> -> vector<2x3xf32>
      %c0_73 = arith.constant 0 : index
      %c0_74 = arith.constant 0 : index
      %161 = vector.load %arg18[%c0_73, %c0_74] : memref<1x3xf32, #tpu.memory_space<vmem>>, vector<1x3xf32>
      %162 = vector.broadcast %161 : vector<1x3xf32> to vector<2x3xf32>
      %163 = arith.addf %160, %162 : vector<2x3xf32>
      %c0_75 = arith.constant 0 : index
      %c0_76 = arith.constant 0 : index
      %164 = vector.load %arg19[%c0_75, %c0_76] : memref<2x3xf32, #tpu.memory_space<vmem>>, vector<2x3xf32>
      tpu.vector_store %arg19[%c0_75, %c0_76], %163 {strides = array<i32>} : memref<2x3xf32, #tpu.memory_space<vmem>>, vector<2x3xf32>,
    } else {
    }
    return
  }
  func.func @transform_0(%arg0: i32) -> (i32, i32) {
    %c0_i32 = arith.constant 0 : i32
    %c0_i32_0 = arith.constant 0 : i32
    %c0_i32_1 = arith.constant 0 : i32
    return %c0_i32, %c0_i32_0 : i32, i32
  }
  func.func @transform_1(%arg0: i32) -> (i32, i32, i32) {
    %c0_i32 = arith.constant 0 : i32
    %c0_i32_0 = arith.constant 0 : i32
    %c0_i32_1 = arith.constant 0 : i32
    %c0_i32_2 = arith.constant 0 : i32
    return %c0_i32, %c0_i32_0, %c0_i32_1 : i32, i32, i32
  }
  func.func @transform_2(%arg0: i32) -> (i32, i32) {
    %c0_i32 = arith.constant 0 : i32
    %c0_i32_0 = arith.constant 0 : i32
    %c0_i32_1 = arith.constant 0 : i32
    return %c0_i32, %c0_i32_0 : i32, i32
  }
  func.func @transform_3(%arg0: i32) -> (i32, i32) {
    %c0_i32 = arith.constant 0 : i32
    %c0_i32_0 = arith.constant 0 : i32
    %c0_i32_1 = arith.constant 0 : i32
    return %c0_i32, %c0_i32_0 : i32, i32
  }
  func.func @transform_4(%arg0: i32) -> (i32, i32, i32) {
    %c0_i32 = arith.constant 0 : i32
    %c0_i32_0 = arith.constant 0 : i32
    %c0_i32_1 = arith.constant 0 : i32
    return %arg0, %c0_i32, %c0_i32_0 : i32, i32, i32
  }
  func.func @transform_5(%arg0: i32) -> (i32, i32, i32) {
    %c0_i32 = arith.constant 0 : i32
    %c0_i32_0 = arith.constant 0 : i32
    %c0_i32_1 = arith.constant 0 : i32
    return %arg0, %c0_i32, %c0_i32_0 : i32, i32, i32
  }
  func.func @transform_6(%arg0: i32) -> (i32, i32, i32) {
    %c0_i32 = arith.constant 0 : i32
    %c0_i32_0 = arith.constant 0 : i32
    %c0_i32_1 = arith.constant 0 : i32
    return %arg0, %c0_i32, %c0_i32_0 : i32, i32, i32
  }
  func.func @transform_7(%arg0: i32) -> (i32, i32, i32) {
    %c0_i32 = arith.constant 0 : i32
    %c0_i32_0 = arith.constant 0 : i32
    %c0_i32_1 = arith.constant 0 : i32
    return %arg0, %c0_i32, %c0_i32_0 : i32, i32, i32
  }
  func.func @transform_8(%arg0: i32) -> (i32, i32, i32) {
    %c0_i32 = arith.constant 0 : i32
    %c0_i32_0 = arith.constant 0 : i32
    %c0_i32_1 = arith.constant 0 : i32
    return %arg0, %c0_i32, %c0_i32_0 : i32, i32, i32
  }
  func.func @transform_9(%arg0: i32) -> (i32, i32, i32) {
    %c0_i32 = arith.constant 0 : i32
    %c0_i32_0 = arith.constant 0 : i32
    %c0_i32_1 = arith.constant 0 : i32
    return %arg0, %c0_i32, %c0_i32_0 : i32, i32, i32
  }
  func.func @transform_10(%arg0: i32) -> (i32, i32, i32) {
    %c0_i32 = arith.constant 0 : i32
    %c0_i32_0 = arith.constant 0 : i32
    %c0_i32_1 = arith.constant 0 : i32
    return %arg0, %c0_i32, %c0_i32_0 : i32, i32, i32
  }
  func.func @transform_11(%arg0: i32) -> (i32, i32, i32) {
    %c0_i32 = arith.constant 0 : i32
    %c0_i32_0 = arith.constant 0 : i32
    %c0_i32_1 = arith.constant 0 : i32
    return %arg0, %c0_i32, %c0_i32_0 : i32, i32, i32
  }
  func.func @transform_12(%arg0: i32) -> (i32, i32, i32) {
    %c0_i32 = arith.constant 0 : i32
    %c0_i32_0 = arith.constant 0 : i32
    %c0_i32_1 = arith.constant 0 : i32
    return %arg0, %c0_i32, %c0_i32_0 : i32, i32, i32
  }
  func.func @transform_13(%arg0: i32) -> (i32, i32, i32) {
    %c0_i32 = arith.constant 0 : i32
    %c0_i32_0 = arith.constant 0 : i32
    %c0_i32_1 = arith.constant 0 : i32
    return %arg0, %c0_i32, %c0_i32_0 : i32, i32, i32
  }
  func.func @transform_14(%arg0: i32) -> (i32, i32, i32) {
    %c0_i32 = arith.constant 0 : i32
    %c0_i32_0 = arith.constant 0 : i32
    %c0_i32_1 = arith.constant 0 : i32
    return %arg0, %c0_i32, %c0_i32_0 : i32, i32, i32
  }
  func.func @transform_15(%arg0: i32) -> (i32, i32, i32) {
    %c0_i32 = arith.constant 0 : i32
    %c0_i32_0 = arith.constant 0 : i32
    %c0_i32_1 = arith.constant 0 : i32
    return %arg0, %c0_i32, %c0_i32_0 : i32, i32, i32
  }
  func.func @transform_16(%arg0: i32) -> (i32, i32) {
    %c0_i32 = arith.constant 0 : i32
    %c0_i32_0 = arith.constant 0 : i32
    %c0_i32_1 = arith.constant 0 : i32
    return %c0_i32, %c0_i32_0 : i32, i32
  }
  func.func @transform_17(%arg0: i32) -> (i32, i32) {
    %c0_i32 = arith.constant 0 : i32
    %c0_i32_0 = arith.constant 0 : i32
    %c0_i32_1 = arith.constant 0 : i32
    return %c0_i32, %c0_i32_0 : i32, i32
  }
  func.func @transform_18(%arg0: i32) -> (i32, i32) {
    %c0_i32 = arith.constant 0 : i32
    %c0_i32_0 = arith.constant 0 : i32
    %c0_i32_1 = arith.constant 0 : i32
    return %c0_i32, %c0_i32_0 : i32, i32
  }
}

</mosaic_0001>

<bundles_post_ra>
// kernel: bert_classifier_forward.1
= control target key start
LH: loop header
LB: loop body
LE: loop exit
PB: predicated region body
PF: predicated region fallthrough
CT: control target
= control target key end

     0   :  { %s2607_s0 = inlined_call_operand.vmem [shape: f32[16,32], index: 0, kind: input, shape index: {}]   ;;  %s2608_s1 = inlined_call_operand.vmem [shape: f32[2,1,8], index: 1, kind: input, shape index: {}]   ;;  %s2609_s2 = inlined_call_operand.vmem [shape: f32[1,32], index: 2, kind: input, shape index: {}]   ;;  %s2610_s3 = inlined_call_operand.vmem [shape: f32[1,32], index: 3, kind: input, shape index: {}]   ;;  %s2611_s4 = inlined_call_operand.vmem [shape: bf16[2,32,96], index: 4, kind: input, shape index: {}]   ;;  %s2612_s5 = inlined_call_operand.vmem [shape: f32[2,1,96], index: 5, kind: input, shape index: {}]   ;;  %s2613_s6 = inlined_call_operand.vmem [shape: bf16[2,32,32], index: 6, kind: input, shape index: {}]   ;;  %s2614_s7 = inlined_call_operand.vmem [shape: f32[2,1,32], index: 7, kind: input, shape index: {}]   ;;  %s2615_s8 = inlined_call_operand.vmem [shape: f32[2,1,32], index: 8, kind: input, shape index: {}]   ;;  %s2616_s9 = inlined_call_operand.vmem [shape: f32[2,1,32], index: 9, kind: input, shape index: {}]   ;;  %s2617_s10 = inlined_call_operand.vmem [shape: bf16[2,32,64], index: 10, kind: input, shape index: {}]   ;;  %s2618_s11 = inlined_call_operand.vmem [shape: f32[2,1,64], index: 11, kind: input, shape index: {}]   ;;  %s2619_s12 = inlined_call_operand.vmem [shape: bf16[2,64,32], index: 12, kind: input, shape index: {}]   ;;  %s2620_s13 = inlined_call_operand.vmem [shape: f32[2,1,32], index: 13, kind: input, shape index: {}]   ;;  %s2621_s14 = inlined_call_operand.vmem [shape: f32[2,1,32], index: 14, kind: input, shape index: {}]   ;;  %s2622_s15 = inlined_call_operand.vmem [shape: f32[2,1,32], index: 15, kind: input, shape index: {}]   ;;  %s2623_s16 = inlined_call_operand.vmem [shape: bf16[32,3], index: 16, kind: input, shape index: {}]   ;;  %s2624_s17 = inlined_call_operand.vmem [shape: f32[1,3], index: 17, kind: input, shape index: {}]   ;;  %s2625_s18 = inlined_call_operand.hbm [shape: f32[2,3], index: 18, kind: output, shape index: {}]  }
   0x1   :  { %2631 = sst [smem:[#allocation8_spill]] %s2607_s0 }
   0x2   :  { %2632 = sst [smem:[#allocation9_spill]] %s2608_s1 }
   0x3   :  { %2633 = sst [smem:[#allocation10_spill]] %s2609_s2 }
   0x4   :  { %2634 = sst [smem:[#allocation11_spill]] %s2611_s4 }
   0x5   :  { %2635 = sst [smem:[#allocation12_spill]] %s2613_s6 }
   0x6   :  { %2636 = sst [smem:[#allocation13_spill]] %s2623_s16 }
   0x7   :  { %2637 = sst [smem:[#allocation14_spill]] %s2624_s17 }
   0x8   :  { %2638 = sst [smem:[#allocation15_spill]] %s2625_s18 }
   0x9   :  { %23 = vsyncpa [#allocation4], 0  ;;  %s2326_s27 = smov 0  }
   0xa LB: > { %2639 = sst [smem:[#allocation6_spill]] %s2219_s27  ;;  %s2332_s28 = sadd.s32 4294967295, %s2219_s27   ;;  %s2219_s27 = sphi %s2326_s27, %s29_s27  }
   0xb   : > { %p1929_p0 = scmp.ge.s32.totalorder %s2219_s27, 1  ;;  %p602_p1 = scmp.lt.s32.totalorder %s2219_s27, 3 }
   0xd   : > { %p603_p2 = pnand %p1929_p0, %p602_p1 }
   0xf   : > { %606 = sbr.rel (%p603_p2) target bundleno = 3107 (0xc23), region = 92 }
  0x14   : > { %p690_p3 = scmp.lt.s32.totalorder %s2332_s28, 1  ;;  %s2640_s4 = sld [smem:[#allocation11_spill]] }
  0x15   : > { %s2641_s6 = sld [smem:[#allocation12_spill]]  ;;  %p1938_p4 = scmp.ne.s32.totalorder %s2332_s28, 0 }
  0x16   : > { %s2338_s29 = scalar_select %p690_p3, %s2332_s28, 1 }
  0x17   : > { %s2643_s25 = sld [smem:[#allocation8_spill]] (!%p1938_p4) }
  0x18   : > { %s1983_s30 = sshll.u32 %s2338_s29, 4  ;;  %s727_s0 = scalar_lea.vmem %s2620_s13, %s2338_s29 }
  0x19   : > { %s730_s20 = scalar_lea.vmem %s2621_s14, %s2338_s29  ;;  %s733_s16 = scalar_lea.vmem %s2622_s15, %s2338_s29 }
  0x1a   : > { %s2348_s22 = scalar_lea.vmem %s2640_s4, %s1983_s30  ;;  %s2370_s4 = scalar_lea.vmem %s2617_s10, %s1983_s30 }
  0x1b   : > { %s2353_s24 = scalar_lea.vmem %s2641_s6, %s1983_s30  ;;  %s719_s6 = scalar_lea.vmem %s2618_s11, %s2338_s29 }
  0x1c   : > { %2642 = sst [smem:[#allocation7_spill]] %s2353_s24  ;;  %s1986_s24 = sshll.u32 %s2338_s29, 5 }
  0x1d   : > { %s2380_s27 = scalar_lea.vmem %s2619_s12, %s1986_s24  ;;  %738 = sbr.rel (%p1938_p4) target bundleno = 348 (0x15c), region = 96 }
  0x1e   : > { %s2644_s18 = sld [smem:[#allocation10_spill]] (!%p1938_p4) }
  0x22   : > { %v739_v0 = vld [vmem:[%s2643_s25] sm:$0xff]  ;;  %vm743_vm0 = vcmask 261120   ;;  %v740_v1 = vld [vmem:[%s2643_s25 + $0x8] sm:$0xff] }
  0x23   : > { %v744_v2 = vsel %vm743_vm0, %v739_v0, 0.0  ;;  %v747_v3 = vsel %vm743_vm0, %v740_v1, 0.0  ;;  %v1940_v23 = vld [vmem:[%s2610_s3] ss:$0 sm:$0xff] }
  0x24   : > { %745 = vadd.xlane.f32.xlu0 %v744_v2  ;;  %v1939_v21 = vld [vmem:[%s2644_s18] ss:$0 sm:$0xff] }
  0x28   : > { %748 = vadd.xlane.f32.xlu0 %v747_v3 }
  0xad   : > { %v746_v4 = vpop.xlane.xlu0 %745 }
  0xae   : > { %v751_v5 = vmul.f32 0.03125, %v746_v4 }
  0xb0   : > { %v753_v6 = vsub.f32 %v739_v0, %v751_v5 }
  0xb1   : > { %v749_v7 = vpop.xlane.xlu0 %748 }
  0xb2   : > { %v752_v8 = vmul.f32 0.03125, %v749_v7  ;;  %v755_v9 = vmul.f32 %v753_v6, %v753_v6 }
  0xb4   : > { %v754_v10 = vsub.f32 %v740_v1, %v752_v8  ;;  %v757_v11 = vsel %vm743_vm0, %v755_v9, 0.0 }
  0xb5   : > { %758 = vadd.xlane.f32.xlu1 %v757_v11 }
  0xb6   : > { %v756_v12 = vmul.f32 %v754_v10, %v754_v10 }
  0xb8   : > { %v760_v13 = vsel %vm743_vm0, %v756_v12, 0.0 }
  0xb9   : > { %761 = vadd.xlane.f32.xlu1 %v760_v13 }
 0x13e   : > { %v759_v14 = vpop.xlane.xlu1 %758 }
 0x13f   : > { %v763_v15 = vmul.f32 0.03125, %v759_v14 }
 0x141   : > { %v765_v16 = vadd.f32 1e-12, %v763_v15 }
 0x142   : > { %v762_v17 = vpop.xlane.xlu1 %761 }
 0x143   : > { %2141 = vrsqrt.f32 %v765_v16  ;;  %v764_v18 = vmul.f32 0.03125, %v762_v17 }
 0x145   : > { %v766_v19 = vadd.f32 1e-12, %v764_v18 }
 0x147   : > { %2143 = vrsqrt.f32 %v766_v19 }
 0x150   : > { %v2142_v20 = vpop.eup %2141 }
 0x151   : > { %v769_v22 = vmul.f32 %v2142_v20, %v753_v6 }
 0x153   : > { %v777_v24 = vmul.f32 %v1939_v21, %v769_v22 }
 0x154   : > { %v2144_v25 = vpop.eup %2143 }
 0x155   : > { %v785_v26 = vadd.f32 %v1940_v23, %v777_v24  ;;  %v770_v27 = vmul.f32 %v2144_v25, %v754_v10 }
 0x157   : > { %787 = vst.msk [vmem:[#allocation2] sm:$0xff] %vm743_vm0, %v785_v26  ;;  %v778_v28 = vmul.f32 %v1939_v21, %v770_v27 }
 0x159   : > { %v786_v29 = vadd.f32 %v1940_v23, %v778_v28 }
 0x15b   : > { %788 = vst.msk [vmem:[#allocation2 + $0x8] sm:$0xff] %vm743_vm0, %v786_v29 }
 0x15c PF: > { %v2145_v30 = vld [vmem:[%s2348_s22 + $0x8] sm:$0xff]   ;;  %v2221_v31 = vmov 0.0   ;;  %v2146_v32 = vld [vmem:[%s2348_s22] sm:$0xff]   ;;  %vm2222_vm1 = vmmov 0   ;;  %vm817_vm2 = vcmask 261120   ;;  %s2645_s2 = scalar_lea.vmem %s2612_s5, %s2338_s29  ;;  %s2223_s23 = smov 96  }
 0x15d   : > { %2021 = vmatprep.subr.bf16.mxu1 %v2221_v31  ;;  %2035 = vmatprep.subr.bf16.mxu0 %v2221_v31  ;;  %v1941_v36 = vld [vmem:[%s2645_s2] ss:$0 sm:$0xff]  ;;  %s2224_s24 = smov 64   ;;  %s2225_s26 = smov 80   ;;  %vm871_vm3 = vcmask 130048   ;;  %vm1005_vm4 = vcmask 1043456  }
 0x15e   : > { %2022 = vmatpush3.bf16.msra.mxu1 %v2145_v30  ;;  %2025 = vmatprep.mubr.msk.bf16.mxu1 %vm2222_vm1, %v2221_v31  ;;  %v2419_v33 = vld [vmem:[#allocation2] sm:$0xff]  ;;  %s2226_s1 = smov 112   ;;  %s2646_s19 = sld [smem:[#allocation9_spill]]  ;;  %vm987_vm5 = vcmask 64512   ;;  %vm1597_vm6 = vcmask 523264  }
 0x15f   : > { %2023 = vmatprep.subr.bf16.mxu1 %v2221_v31  ;;  %2037 = vmatprep.mubr.msk.bf16.mxu0 %vm2222_vm1, %v2221_v31  ;;  %s2227_s21 = smov 48   ;;  %s2647_s2 = sld [smem:[#allocation7_spill]] }
 0x160   : > { %s2650_s22 = scalar_lea.vmem %s2616_s9, %s2338_s29  ;;  %p1974_p5 = scmp.ne.s32.totalorder %s2332_s28, 1 }
 0x161   : > { %s2651_s17 = sld [smem:[#allocation13_spill]] (!%p1974_p5) }
 0x162   : > { %v2421_v34 = vld [vmem:[#allocation2 + $0x8] sm:$0xff]  ;;  %2024 = vmatpush3.bf16.msra.mxu1 %v2146_v32  ;;  %s2652_s30 = sld [smem:[#allocation14_spill]] (!%p1974_p5) }
 0x163   : > { %v793_v35 = vpack.c.bf16 %v2421_v34, %v2419_v33  ;;  %2029 = vmatprep.subr.bf16.mxu1 %v2221_v31 }
 0x164   : > { %v2466_v51 = vld [vmem:[%s2646_s19] ss:$0 sm:$0xff]  ;;  %v2472_v57 = vld [vmem:[%s2646_s19 + $0x1] ss:$0 sm:$0xff] }
 0x165   : > { %2026 = vmatmul.mubr.msk.bf16.vlgmr.msra.gmra.mxu1 %vm817_vm2, %v793_v35 }
 0x166   : > { %2031 = vmatprep.mubr.msk.bf16.mxu1 %vm2222_vm1, %v2221_v31 }
 0x225   : > { %v855_v37 = vpop.f32.mrf.mxu1 }
 0x226   : > { %v856_v38 = vadd.f32 %v1941_v36, %v855_v37 }
 0x227   : > { %v2027_v39 = vpop.f32.mrf.mxu1 }
 0x228   : > { %v2437_v40 = vpack.c.bf16 %v856_v38, %v856_v38 }
 0x229   : > { %v858_v41 = vpop.f32.mrf.mxu1 }
 0x22a   : > { %v859_v42 = vadd.f32 %v1941_v36, %v858_v41  ;;  %869 = vrot.lane.b32.xlu0 %v2437_v40, %s2223_s23 }
 0x22b   : > { %v2028_v43 = vpop.f32.mrf.mxu1 }
 0x22c   : > { %v2440_v44 = vpack.c.bf16 %v859_v42, %v859_v42 }
 0x22e   : > { %919 = vrot.lane.b32.xlu0 %v2440_v44, %s2223_s23 }
 0x232   : > { %1000 = vrot.lane.b32.xlu0 %v2437_v40, %s2224_s24 }
 0x236   : > { %1100 = vrot.lane.b32.xlu0 %v2437_v40, %s2225_s26 }
 0x23a   : > { %1150 = vrot.lane.b32.xlu0 %v2440_v44, %s2225_s26  ;;  %s2648_s26 = scalar_lea.vmem %s2614_s7, %s2338_s29 }
 0x23e   : > { %1098 = vrot.lane.b32.xlu0 %v2437_v40, %s2226_s1 }
 0x242   : > { %1148 = vrot.lane.b32.xlu0 %v2440_v44, %s2226_s1 }
 0x29c   : > { %v870_v45 = vpop.permute.xlu0 %869 }
 0x29d   : > { %v876_v46 = vsel %vm871_vm3, %v870_v45, 0 }
 0x29e   : > { %2030 = vmatpush3.bf16.xpose.msra.mxu1 %v876_v46 }
 0x29f   : > { %2041 = vmatprep.subr.bf16.mxu1 %v2221_v31 }
 0x2a0   : > { %v920_v47 = vpop.permute.xlu0 %919 }
 0x2a1   : > { %v925_v48 = vsel %vm871_vm3, %v920_v47, 0 }
 0x2a2   : > { %2036 = vmatpush3.bf16.xpose.msra.mxu0 %v925_v48 }
 0x2a3   : > { %2047 = vmatprep.subr.bf16.mxu0 %v2221_v31 }
 0x2a4   : > { %v1001_v49 = vpop.permute.xlu0 %1000 }
 0x2a5   : > { %v1007_v50 = vsel %vm1005_vm4, %v1001_v49, 0  ;;  %2032 = vmatmul.mubr.msk.bf16.vlgmr.msra.gmra.mxu1 %vm871_vm3, %v2437_v40 }
 0x2a6   : > { %2042 = vmatpush3.bf16.msra.mxu1 %v1007_v50  ;;  %2043 = vmatprep.mubr.msk.bf16.mxu1 %vm2222_vm1, %v2221_v31 }
 0x2a7   : > { %2053 = vmatprep.subr.bf16.mxu1 %v2221_v31 }
 0x2a8   : > { %v1101_v11 = vpop.permute.xlu0 %1100 }
 0x2a9   : > { %2038 = vmatmul.mubr.msk.bf16.vlgmr.msra.gmra.mxu0 %vm871_vm3, %v2440_v44  ;;  %v1106_v17 = vsel %vm871_vm3, %v1101_v11, 0 }
 0x2aa   : > { %2049 = vmatprep.mubr.msk.bf16.mxu0 %vm2222_vm1, %v2221_v31 }
 0x2ac   : > { %v1151_v16 = vpop.permute.xlu0 %1150 }
 0x2ad   : > { %v1156_v20 = vsel %vm871_vm3, %v1151_v16, 0 }
 0x2b0   : > { %v1099_v21 = vpop.permute.xlu0 %1098 }
 0x2b4   : > { %v1149_v22 = vpop.permute.xlu0 %1148 }
 0x365   : > { %v912_v52 = vpop.f32.mrf.mxu1 }
 0x366   : > { %v967_v53 = vmul.f32 0.25, %v912_v52 }
 0x367   : > { %v2033_v54 = vpop.f32.mrf.mxu1 }
 0x368   : > { %v981_v55 = vadd.f32 %v2466_v51, %v967_v53 }
 0x369   : > { %v915_v56 = vpop.f32.mrf.mxu1  ;;  %v961_v58 = vpop.f32.mrf.mxu0 }
 0x36a   : > { %v983_v59 = vmul.f32 1.442695, %v981_v55  ;;  %v968_v60 = vmul.f32 0.25, %v961_v58 }
 0x36b   : > { %v2034_v61 = vpop.f32.mrf.mxu1  ;;  %v2039_v62 = vpop.f32.mrf.mxu0 }
 0x36c   : > { %2155 = vpow2.f32 %v983_v59  ;;  %v982_v63 = vadd.f32 %v2472_v57, %v968_v60 }
 0x36d   : > { %v964_v0 = vpop.f32.mrf.mxu0 }
 0x36e   : > { %v985_v1 = vmul.f32 1.442695, %v982_v63  ;;  %v2147_v0 = vld [vmem:[%s2647_s2] sm:$0xff]  }
 0x36f   : > { %v2040_v2 = vpop.f32.mrf.mxu0 }
 0x370   : > { %2157 = vpow2.f32 %v985_v1  ;;  %v2148_v2 = vld [vmem:[%s2647_s2 + $0x8] sm:$0xff]  }
 0x379   : > { %v2156_v3 = vpop.eup %2155 }
 0x37a   : > { %v988_v4 = vsel %vm987_vm5, %v2156_v3, 0.0 }
 0x37b   : > { %989 = vadd.xlane.f32.xlu1 %v988_v4 }
 0x37d   : > { %v2158_v5 = vpop.eup %2157 }
 0x37e   : > { %v991_v6 = vsel %vm987_vm5, %v2158_v5, 0.0 }
 0x37f   : > { %992 = vadd.xlane.f32.xlu1 %v991_v6 }
 0x390   : > { %1049 = vrot.lane.b32.xlu1 %v2440_v44, %s2224_s24 }
 0x404   : > { %v990_v7 = vpop.xlane.xlu1 %989 }
 0x405   : > { %2159 = vrcp.f32 %v990_v7 }
 0x408   : > { %v993_v8 = vpop.xlane.xlu1 %992 }
 0x409   : > { %2161 = vrcp.f32 %v993_v8 }
 0x40c   : > { %v1050_v9 = vpop.permute.xlu1 %1049 }
 0x40d   : > { %v1055_v10 = vsel %vm1005_vm4, %v1050_v9, 0 }
 0x40e   : > { %2048 = vmatpush3.bf16.msra.mxu0 %v1055_v10 }
 0x40f   : > { %2059 = vmatprep.subr.bf16.mxu0 %v2221_v31 }
 0x412   : > { %v2160_v12 = vpop.eup %2159 }
 0x413   : > { %v996_v13 = vmul.f32 %v2160_v12, %v2156_v3 }
 0x415   : > { %v998_v14 = vpack.c.bf16 %v996_v13, %v996_v13 }
 0x416   : > { %v2162_v15 = vpop.eup %2161 }
 0x417   : > { %2044 = vmatmul.mubr.msk.bf16.vlgmr.msra.gmra.mxu1 %vm987_vm5, %v998_v14  ;;  %v997_v18 = vmul.f32 %v2162_v15, %v2158_v5 }
 0x418   : > { %2054 = vmatpush3.bf16.xpose.msra.mxu1 %v1106_v17  ;;  %2055 = vmatprep.mubr.msk.bf16.mxu1 %vm2222_vm1, %v2221_v31  ;;  %v1959_v17 = vld [vmem:[%s2648_s26] ss:$0 sm:$0xff] }
 0x419   : > { %v999_v19 = vpack.c.bf16 %v997_v18, %v997_v18  ;;  %2065 = vmatprep.subr.bf16.mxu1 %v2221_v31 }
 0x41b   : > { %2050 = vmatmul.mubr.msk.bf16.vlgmr.msra.gmra.mxu0 %vm987_vm5, %v999_v19 }
 0x41c   : > { %2060 = vmatpush3.bf16.xpose.msra.mxu0 %v1156_v20  ;;  %2061 = vmatprep.mubr.msk.bf16.mxu0 %vm2222_vm1, %v2221_v31 }
 0x41d   : > { %2071 = vmatprep.subr.bf16.mxu0 %v2221_v31 }
 0x41f   : > { %2056 = vmatmul.mubr.msk.bf16.vlgmr.msra.gmra.mxu1 %vm871_vm3, %v1099_v21 }
 0x420   : > { %2067 = vmatprep.mubr.msk.bf16.mxu1 %vm2222_vm1, %v2221_v31 }
 0x423   : > { %2062 = vmatmul.mubr.msk.bf16.vlgmr.msra.gmra.mxu0 %vm871_vm3, %v1149_v22 }
 0x424   : > { %2073 = vmatprep.mubr.msk.bf16.mxu0 %vm2222_vm1, %v2221_v31 }
 0x4d7   : > { %v1043_v23 = vpop.f32.mrf.mxu1 }
 0x4d9   : > { %v2045_v24 = vpop.f32.mrf.mxu1 }
 0x4db   : > { %v1046_v25 = vpop.f32.mrf.mxu1  ;;  %v1091_v26 = vpop.f32.mrf.mxu0 }
 0x4dc   : > { %v1097_v27 = vpack.c.bf16 %v1091_v26, %v1043_v23 }
 0x4dd   : > { %v2046_v28 = vpop.f32.mrf.mxu1  ;;  %v2051_v29 = vpop.f32.mrf.mxu0 }
 0x4df   : > { %v1094_v30 = vpop.f32.mrf.mxu0  ;;  %v1142_v32 = vpop.f32.mrf.mxu1 }
 0x4e0   : > { %v1198_v35 = vmul.f32 0.25, %v1142_v32 }
 0x4e1   : > { %v2052_v36 = vpop.f32.mrf.mxu0  ;;  %v2057_v37 = vpop.f32.mrf.mxu1 }
 0x4e2   : > { %v1200_v38 = vadd.f32 %v2466_v51, %v1198_v35 }
 0x4e3   : > { %v1145_v39 = vpop.f32.mrf.mxu1  ;;  %v1192_v41 = vpop.f32.mrf.mxu0 }
 0x4e4   : > { %v1202_v42 = vmul.f32 1.442695, %v1200_v38  ;;  %v1199_v43 = vmul.f32 0.25, %v1192_v41 }
 0x4e5   : > { %v2058_v45 = vpop.f32.mrf.mxu1  ;;  %v2063_v46 = vpop.f32.mrf.mxu0 }
 0x4e6   : > { %2163 = vpow2.f32 %v1202_v42  ;;  %v1201_v47 = vadd.f32 %v2472_v57, %v1199_v43  ;;  %v2150_v42 = vld [vmem:[%s2370_s4] sm:$0xff]  }
 0x4e7   : > { %v1195_v48 = vpop.f32.mrf.mxu0 }
 0x4e8   : > { %v1204_v49 = vmul.f32 1.442695, %v1201_v47 }
 0x4e9   : > { %v2064_v50 = vpop.f32.mrf.mxu0 }
 0x4ea   : > { %2165 = vpow2.f32 %v1204_v49 }
 0x4f3   : > { %v2164_v52 = vpop.eup %2163 }
 0x4f4   : > { %v1206_v53 = vsel %vm987_vm5, %v2164_v52, 0.0 }
 0x4f5   : > { %1207 = vadd.xlane.f32.xlu1 %v1206_v53 }
 0x4f7   : > { %v2166_v54 = vpop.eup %2165 }
 0x4f8   : > { %v1209_v51 = vsel %vm987_vm5, %v2166_v54, 0.0 }
 0x4f9   : > { %1210 = vadd.xlane.f32.xlu0 %v1209_v51 }
 0x506   : > { %1266 = vrot.lane.b32.xlu1 %v2440_v44, %s2227_s21 }
 0x50f   : > { %1218 = vrot.lane.b32.xlu0 %v2437_v40, %s2227_s21 }
 0x57e   : > { %v1208_v55 = vpop.xlane.xlu1 %1207 }
 0x57f   : > { %2167 = vrcp.f32 %v1208_v55 }
 0x582   : > { %v1211_v56 = vpop.xlane.xlu0 %1210  ;;  %v1267_v57 = vpop.permute.xlu1 %1266 }
 0x583   : > { %2169 = vrcp.f32 %v1211_v56  ;;  %v1272_v58 = vsel %vm1005_vm4, %v1267_v57, 0  ;;  %v1961_v56 = vld [vmem:[%s2650_s22] ss:$0 sm:$0xff] }
 0x584   : > { %2072 = vmatpush3.bf16.msra.mxu0 %v1272_v58 }
 0x585   : > { %2083 = vmatprep.subr.bf16.mxu0 %v2221_v31 }
 0x586   : > { %v1219_v59 = vpop.permute.xlu0 %1218 }
 0x587   : > { %v1224_v60 = vsel %vm1005_vm4, %v1219_v59, 0 }
 0x588   : > { %2066 = vmatpush3.bf16.msra.mxu1 %v1224_v60 }
 0x589   : > { %2077 = vmatprep.subr.bf16.mxu1 %v2221_v31 }
 0x58c   : > { %v2168_v44 = vpop.eup %2167 }
 0x58d   : > { %v1214_v40 = vmul.f32 %v2168_v44, %v2164_v52  ;;  %v2151_v44 = vld [vmem:[%s2380_s27 + $0x18] sm:$0xff]  }
 0x58f   : > { %v1216_v61 = vpack.c.bf16 %v1214_v40, %v1214_v40  ;;  %v2152_v40 = vld [vmem:[%s2380_s27 + $0x10] sm:$0xff]  }
 0x590   : > { %v2170_v62 = vpop.eup %2169 }
 0x591   : > { %2068 = vmatmul.mubr.msk.bf16.vlgmr.msra.gmra.mxu1 %vm987_vm5, %v1216_v61  ;;  %v1215_v63 = vmul.f32 %v2170_v62, %v2166_v54  ;;  %v2153_v61 = vld [vmem:[%s2380_s27 + $0x8] sm:$0xff]   ;;  %v2154_v62 = vld [vmem:[%s2380_s27] sm:$0xff]  }
 0x592   : > { %2079 = vmatprep.mubr.msk.bf16.mxu1 %vm2222_vm1, %v2221_v31  ;;  %2078 = vmatpush3.bf16.msra.mxu1 %v2148_v2 }
 0x593   : > { %v1217_v1 = vpack.c.bf16 %v1215_v63, %v1215_v63  ;;  %2089 = vmatprep.subr.bf16.mxu1 %v2221_v31  ;;  %v1962_v63 = vld [vmem:[%s719_s6] ss:$0 sm:$0xff] }
 0x595   : > { %2074 = vmatmul.mubr.msk.bf16.vlgmr.msra.gmra.mxu0 %vm987_vm5, %v1217_v1 }
 0x596   : > { %2084 = vmatpush3.bf16.msra.mxu0 %v2147_v0  ;;  %2085 = vmatprep.mubr.msk.bf16.mxu0 %vm2222_vm1, %v2221_v31 }
 0x597   : > { %2097 = vmatprep.subr.bf16.mxu0 %v2221_v31 }
 0x59d   : > { %2086 = vmatmul.mubr.msk.bf16.vlgmr.msra.gmra.mxu0 %vm871_vm3, %v1097_v27 }
 0x59e   : > { %2105 = vmatprep.mubr.msk.bf16.mxu0 %vm2222_vm1, %v2221_v31  ;;  %2098 = vmatpush3.bf16.msra.mxu0 %v2151_v44 }
 0x59f   : > { %2099 = vmatprep.subr.bf16.mxu0 %v2221_v31 }
 0x5a2   : > { %2100 = vmatpush3.bf16.msra.mxu0 %v2152_v40 }
 0x5a3   : > { %2101 = vmatprep.subr.bf16.mxu0 %v2221_v31 }
 0x5a6   : > { %2102 = vmatpush3.bf16.msra.mxu0 %v2153_v61 }
 0x5a7   : > { %2103 = vmatprep.subr.bf16.mxu0 %v2221_v31 }
 0x5aa   : > { %2104 = vmatpush3.bf16.msra.mxu0 %v2154_v62 }
 0x651   : > { %v1260_v3 = vpop.f32.mrf.mxu1 }
 0x653   : > { %v2069_v4 = vpop.f32.mrf.mxu1 }
 0x655   : > { %v1263_v5 = vpop.f32.mrf.mxu1  ;;  %v1308_v6 = vpop.f32.mrf.mxu0 }
 0x656   : > { %v1314_v7 = vpack.c.bf16 %v1308_v6, %v1260_v3 }
 0x657   : > { %v2070_v8 = vpop.f32.mrf.mxu1  ;;  %v2075_v9 = vpop.f32.mrf.mxu0 }
 0x658   : > { %2080 = vmatmul.mubr.msk.bf16.vlgmr.msra.gmra.mxu1 %vm871_vm3, %v1314_v7 }
 0x659   : > { %v1311_v10 = vpop.f32.mrf.mxu0  ;;  %2093 = vmatprep.mubr.msk.bf16.mxu1 %vm2222_vm1, %v2221_v31 }
 0x65b   : > { %v2076_v11 = vpop.f32.mrf.mxu0 }
 0x65d   : > { %v1408_v12 = vpop.f32.mrf.mxu0 }
 0x65f   : > { %v2087_v13 = vpop.f32.mrf.mxu0 }
 0x661   : > { %v1411_v14 = vpop.f32.mrf.mxu0 }
 0x663   : > { %v2088_v15 = vpop.f32.mrf.mxu0 }
 0x718   : > { %v1358_v16 = vpop.f32.mrf.mxu1 }
 0x719   : > { %v1409_v18 = vadd.f32 %v1408_v12, %v1358_v16 }
 0x71a   : > { %v2081_v19 = vpop.f32.mrf.mxu1 }
 0x71b   : > { %v1422_v20 = vadd.f32 %v1959_v17, %v1409_v18 }
 0x71c   : > { %v1361_v21 = vpop.f32.mrf.mxu1 }
 0x71d   : > { %v1412_v22 = vadd.f32 %v1411_v14, %v1361_v21  ;;  %v1424_v23 = vadd.f32 %v1422_v20, %v2419_v33 }
 0x71e   : > { %v2082_v24 = vpop.f32.mrf.mxu1 }
 0x71f   : > { %v1423_v25 = vadd.f32 %v1959_v17, %v1412_v22  ;;  %v1428_v26 = vsel %vm817_vm2, %v1424_v23, 0.0  ;;  %v1966_v24 = vld [vmem:[%s727_s0] ss:$0 sm:$0xff] }
 0x720   : > { %1429 = vadd.xlane.f32.xlu1 %v1428_v26 }
 0x721   : > { %v1425_v27 = vadd.f32 %v1423_v25, %v2421_v34  ;;  %v2149_v34 = vld [vmem:[%s2370_s4 + $0x8] sm:$0xff]   ;;  %s2649_s4 = scalar_lea.vmem %s2615_s8, %s2338_s29 }
 0x722   : > { %2090 = vmatpush3.bf16.msra.mxu1 %v2149_v34  ;;  %v1960_v53 = vld [vmem:[%s2649_s4] ss:$0 sm:$0xff] }
 0x723   : > { %v1431_v28 = vsel %vm817_vm2, %v1425_v27, 0.0  ;;  %2091 = vmatprep.subr.bf16.mxu1 %v2221_v31 }
 0x724   : > { %1432 = vadd.xlane.f32.xlu0 %v1431_v28 }
 0x726   : > { %2092 = vmatpush3.bf16.msra.mxu1 %v2150_v42 }
 0x7a9   : > { %v1430_v29 = vpop.xlane.xlu1 %1429 }
 0x7aa   : > { %v1435_v30 = vmul.f32 0.03125, %v1430_v29 }
 0x7ac   : > { %v1437_v32 = vsub.f32 %v1424_v23, %v1435_v30 }
 0x7ad   : > { %v1433_v35 = vpop.xlane.xlu0 %1432 }
 0x7ae   : > { %v1436_v36 = vmul.f32 0.03125, %v1433_v35  ;;  %v1439_v37 = vmul.f32 %v1437_v32, %v1437_v32 }
 0x7b0   : > { %v1438_v38 = vsub.f32 %v1425_v27, %v1436_v36  ;;  %v1441_v33 = vsel %vm817_vm2, %v1439_v37, 0.0 }
 0x7b1   : > { %1442 = vadd.xlane.f32.xlu0 %v1441_v33 }
 0x7b2   : > { %v1440_v39 = vmul.f32 %v1438_v38, %v1438_v38 }
 0x7b4   : > { %v1444_v41 = vsel %vm817_vm2, %v1440_v39, 0.0 }
 0x7b5   : > { %1445 = vadd.xlane.f32.xlu1 %v1444_v41 }
 0x83a   : > { %v1443_v43 = vpop.xlane.xlu0 %1442 }
 0x83b   : > { %v1447_v45 = vmul.f32 0.03125, %v1443_v43 }
 0x83d   : > { %v1449_v46 = vadd.f32 1e-12, %v1447_v45 }
 0x83e   : > { %v1446_v47 = vpop.xlane.xlu1 %1445 }
 0x83f   : > { %2171 = vrsqrt.f32 %v1449_v46  ;;  %v1448_v48 = vmul.f32 0.03125, %v1446_v47 }
 0x841   : > { %v1450_v49 = vadd.f32 1e-12, %v1448_v48 }
 0x843   : > { %2173 = vrsqrt.f32 %v1450_v49 }
 0x84c   : > { %v2172_v50 = vpop.eup %2171 }
 0x84d   : > { %v1453_v52 = vmul.f32 %v2172_v50, %v1437_v32 }
 0x84f   : > { %v1461_v55 = vmul.f32 %v1960_v53, %v1453_v52 }
 0x850   : > { %v2174_v54 = vpop.eup %2173 }
 0x851   : > { %v1454_v51 = vmul.f32 %v2174_v54, %v1438_v38  ;;  %v1469_v58 = vadd.f32 %v1961_v56, %v1461_v55  ;;  %v1972_v55 = vld [vmem:[%s730_s20] ss:$0 sm:$0xff] }
 0x853   : > { %v1462_v57 = vmul.f32 %v1960_v53, %v1454_v51 }
 0x855   : > { %v1470_v59 = vadd.f32 %v1961_v56, %v1462_v57  ;;  %v1973_v57 = vld [vmem:[%s733_s16] ss:$0 sm:$0xff] }
 0x857   : > { %v1471_v60 = vpack.c.bf16 %v1470_v59, %v1469_v58 }
 0x859   : > { %2094 = vmatmul.mubr.msk.bf16.vlgmr.msra.gmra.mxu1 %vm817_vm2, %v1471_v60 }
 0x919   : > { %v1532_v0 = vpop.f32.mrf.mxu1 }
 0x91a   : > { %v1533_v1 = vadd.f32 %v1962_v63, %v1532_v0 }
 0x91b   : > { %v2095_v2 = vpop.f32.mrf.mxu1 }
 0x91c   : > { %v1539_v3 = vmul.f32 %v1533_v1, %v1533_v1 }
 0x91d   : > { %v1535_v4 = vpop.f32.mrf.mxu1 }
 0x91e   : > { %v1541_v5 = vmul.f32 %v1539_v3, %v1533_v1  ;;  %v1536_v6 = vadd.f32 %v1962_v63, %v1535_v4 }
 0x91f   : > { %v2096_v7 = vpop.f32.mrf.mxu1 }
 0x920   : > { %v1543_v8 = vmul.f32 0.044715, %v1541_v5  ;;  %v1540_v9 = vmul.f32 %v1536_v6, %v1536_v6 }
 0x922   : > { %v1545_v10 = vadd.f32 %v1543_v8, %v1533_v1  ;;  %v1542_v11 = vmul.f32 %v1540_v9, %v1536_v6 }
 0x924   : > { %v1547_v31 = vmul.f32 0.7978846, %v1545_v10  ;;  %v1544_v12 = vmul.f32 0.044715, %v1542_v11 }
 0x926   : > { %2175 = vtanh.f32 %v1547_v31  ;;  %v1546_v13 = vadd.f32 %v1544_v12, %v1536_v6 }
 0x928   : > { %v1548_v14 = vmul.f32 0.7978846, %v1546_v13 }
 0x92a   : > { %2177 = vtanh.f32 %v1548_v14 }
 0x933   : > { %v2176_v15 = vpop.eup %2175 }
 0x934   : > { %v1551_v16 = vadd.f32 1.0, %v2176_v15 }
 0x936   : > { %v1553_v18 = vmul.f32 0.5, %v1551_v16 }
 0x937   : > { %v2178_v17 = vpop.eup %2177 }
 0x938   : > { %v1552_v19 = vadd.f32 1.0, %v2178_v17  ;;  %v1555_v21 = vmul.f32 %v1553_v18, %v1533_v1 }
 0x93a   : > { %v1554_v20 = vmul.f32 0.5, %v1552_v19 }
 0x93c   : > { %v1556_v22 = vmul.f32 %v1554_v20, %v1536_v6 }
 0x93e   : > { %v1557_v23 = vpack.c.bf16 %v1556_v22, %v1555_v21 }
 0x940   : > { %2106 = vmatmul.mubr.msk.bf16.vlgmr.msra.gmra.mxu0 %vm1597_vm6, %v1557_v23 }
 0xa00   : > { %v1635_v25 = vpop.f32.mrf.mxu0 }
 0xa01   : > { %v1636_v26 = vadd.f32 %v1966_v24, %v1635_v25 }
 0xa02   : > { %v2107_v27 = vpop.f32.mrf.mxu0 }
 0xa03   : > { %v1642_v28 = vadd.f32 %v1636_v26, %v1469_v58 }
 0xa04   : > { %v1638_v29 = vpop.f32.mrf.mxu0 }
 0xa05   : > { %v1639_v30 = vadd.f32 %v1966_v24, %v1638_v29  ;;  %v1646_v32 = vsel %vm817_vm2, %v1642_v28, 0.0 }
 0xa06   : > { %1647 = vadd.xlane.f32.xlu0 %v1646_v32  ;;  %v2108_v35 = vpop.f32.mrf.mxu0 }
 0xa07   : > { %v1643_v36 = vadd.f32 %v1639_v30, %v1470_v59 }
 0xa09   : > { %v1649_v37 = vsel %vm817_vm2, %v1643_v36, 0.0 }
 0xa0a   : > { %1650 = vadd.xlane.f32.xlu1 %v1649_v37 }
 0xa8f   : > { %v1648_v38 = vpop.xlane.xlu0 %1647 }
 0xa90   : > { %v1652_v33 = vmul.f32 0.03125, %v1648_v38 }
 0xa92   : > { %v1654_v39 = vsub.f32 %v1642_v28, %v1652_v33 }
 0xa93   : > { %v1651_v41 = vpop.xlane.xlu1 %1650 }
 0xa94   : > { %v1653_v34 = vmul.f32 0.03125, %v1651_v41  ;;  %v1656_v42 = vmul.f32 %v1654_v39, %v1654_v39 }
 0xa96   : > { %v1655_v43 = vsub.f32 %v1643_v36, %v1653_v34  ;;  %v1658_v45 = vsel %vm817_vm2, %v1656_v42, 0.0 }
 0xa97   : > { %1659 = vadd.xlane.f32.xlu0 %v1658_v45 }
 0xa98   : > { %v1657_v46 = vmul.f32 %v1655_v43, %v1655_v43 }
 0xa9a   : > { %v1661_v47 = vsel %vm817_vm2, %v1657_v46, 0.0 }
 0xa9b   : > { %1662 = vadd.xlane.f32.xlu1 %v1661_v47 }
 0xb20   : > { %v1660_v48 = vpop.xlane.xlu0 %1659 }
 0xb21   : > { %v1664_v49 = vmul.f32 0.03125, %v1660_v48 }
 0xb23   : > { %v1666_v50 = vadd.f32 1e-12, %v1664_v49 }
 0xb24   : > { %v1663_v52 = vpop.xlane.xlu1 %1662 }
 0xb25   : > { %2179 = vrsqrt.f32 %v1666_v50  ;;  %v1665_v53 = vmul.f32 0.03125, %v1663_v52 }
 0xb27   : > { %v1667_v54 = vadd.f32 1e-12, %v1665_v53 }
 0xb29   : > { %2181 = vrsqrt.f32 %v1667_v54 }
 0xb32   : > { %v2180_v51 = vpop.eup %2179 }
 0xb33   : > { %v1670_v56 = vmul.f32 %v2180_v51, %v1654_v39 }
 0xb35   : > { %v1678_v58 = vmul.f32 %v1972_v55, %v1670_v56 }
 0xb36   : > { %v2182_v59 = vpop.eup %2181 }
 0xb37   : > { %v1686_v60 = vadd.f32 %v1973_v57, %v1678_v58  ;;  %v1671_v44 = vmul.f32 %v2182_v59, %v1655_v43 }
 0xb39   : > { %1688 = vst.msk [vmem:[#allocation2] sm:$0xff] %vm817_vm2, %v1686_v60  ;;  %v1679_v40 = vmul.f32 %v1972_v55, %v1671_v44  ;;  %1693 = sbr.rel (%p1974_p5) target bundleno = 3086 (0xc0e), region = 100 }
 0xb3b   : > { %v1687_v61 = vadd.f32 %v1973_v57, %v1679_v40 }
 0xb3d   : > { %1689 = vst.msk [vmem:[#allocation2 + $0x8] sm:$0xff] %vm817_vm2, %v1687_v61 }
 0xb3e   : > { %v2183_v62 = vld [vmem:[%s2651_s17 + $0x8] sm:$0xff]   ;;  %v1694_v63 = vpack.c.bf16 %v1686_v60, %v1686_v60  ;;  %v1695_v0 = vpack.c.bf16 %v1687_v61, %v1687_v61  ;;  %v2228_v1 = vmov 0.0   ;;  %v2184_v2 = vld [vmem:[%s2651_s17] sm:$0xff]   ;;  %vm2229_vm7 = vmmov 0  }
 0xb3f   : > { %2109 = vmatprep.subr.bf16.mxu0 %v2228_v1  ;;  %2113 = vmatprep.mubr.msk.bf16.mxu0 %vm2229_vm7, %v2228_v1  ;;  %vm1712_vm8 = vcmask 1041409   ;;  %v1975_v8 = vld [vmem:[%s2652_s30] ss:$0 sm:$0xff]  ;;  %vm1770_vm9 = vcmask 17408  }
 0xb40   : > { %2110 = vmatpush3.bf16.msra.mxu0 %v2183_v62  ;;  %v1709_v3 = vunpack.c.l.b16 %v1694_v63  ;;  %v1710_v4 = vunpack.c.l.b16 %v1695_v0 }
 0xb41   : > { %2111 = vmatprep.subr.bf16.mxu0 %v2228_v1 }
 0xb42   : > { %v1711_v5 = vrot.slane %v1710_v4, 7 }
 0xb44   : > { %2112 = vmatpush3.bf16.msra.mxu0 %v2184_v2  ;;  %v1713_v6 = vsel %vm1712_vm8, %v1711_v5, %v1709_v3 }
 0xb45   : > { %v1714_v7 = vpack.c.b16 %v1713_v6, %v1713_v6 }
 0xb47   : > { %2114 = vmatmul.mubr.msk.bf16.vlgmr.msra.gmra.mxu0 %vm817_vm2, %v1714_v7 }
 0xc07   : > { %v1764_v9 = vpop.f32.mrf.mxu0 }
 0xc08   : > { %v1765_v10 = vadd.f32 %v1975_v8, %v1764_v9 }
 0xc09   : > { %v2115_v11 = vpop.f32.mrf.mxu0 }
 0xc0a   : > { %1771 = vst.msk [vmem:[#allocation3] sm:$0x3] %vm1770_vm9, %v1765_v10 }
 0xc0b   : > { %v1767_v31 = vpop.f32.mrf.mxu0 }
 0xc0d   : > { %v2116_v12 = vpop.f32.mrf.mxu0 }
 0xc0e PF: > { %p2121_p6 = scmp.eq.s32.totalorder %s2332_s28, 1  ;;  %s2230_s22 = smov [#allocation3]  }
 0xc0f   : > { %s1779_s21 = sshll.u32 %s2230_s22, 4  ;;  %s1780_s21 = int_to_ptr.vmem [resolvable:$true] %s1779_s21 }
 0xc10   : > { %s2185_s2 = scalar_lea.vmem %s1780_s21, 32  ;;  %p2192_p10 = scmp.lt.s32.totalorder %s1780_s21, %s1780_s21 }
 0xc11   : > { %p2186_p7 = scmp.ne.s32.totalorder %s1780_s21, %s2185_s2  ;;  %p2193_p11 = scmp.lt.s32.totalorder %s2185_s2, %s2185_s2 }
 0xc13   : > { %p2187_p8 = pnand %p2186_p7, %p2121_p6  ;;  %p2194_p12 = por %p2193_p11, %p2192_p10 }
 0xc15   : > { %p2188_p9 = pneg %p2187_p8 }
 0xc17   : > { %p2195_p13 = pnand %p2194_p12, %p2188_p9 }
 0xc19   : > { %2198 = shalt.err (!%p2195_p13)
}
 0xc1a   : > { %s2653_s0 = sld [smem:[#allocation15_spill]] }
 0xc20   : > { %2118 = dma.vmem_to_hbm [thread:$0]  (%p2121_p6), %s1780_s21, 32, %s2653_s0, [#allocation4]  }
 0xc21   : > { %2214 = dma.done.wait (%p2121_p6), [#allocation4], 32  }
 0xc22   : > { %2216 = vsyncadd (%p2121_p6), [#allocation4], 4294967264 }
 0xc23 PF: > { %s2654_s23 = sld [smem:[#allocation6_spill]] }
 0xc29   : > { %s29_s27 = sadd.s32 1, %s2654_s23  }
 0xc2a   : > { %p26_p0 = scmp.ge.s32.totalorder %s29_s27, 4  }
 0xc2c   :  { %28 = sbr.rel (!%p26_p0) target bundleno = 10 (0xa), region = 160 }
 0xc31   :  { %1792 = vsyncpa [#allocation4], 1 }
 0xc32   :  { %1794 = vsyncpa [#allocation4 + $0x1], 1 }

</bundles_post_ra>
